<compile_context>
chip_gen: v5e
topology: v5e:2x2
jax: 0.10.0
libtpu: 0.0.40
codegen_flags: <defaults>
</compile_context>

<pallas_src>
import jax
import jax.numpy as jnp
from jax.experimental import pallas as pl
from jax.experimental.pallas import tpu as pltpu

LATENT_DIM = 50


def _round_up(x, m):
    return ((x + m - 1) // m) * m


def _flow_layer_kernel(scal_ref, uw_ref, z_ref, z_out_ref, ld_out_ref):
    # scalar path (SMEM): bias and precomputed u.w
    b = scal_ref[0]
    wu = scal_ref[1]

    # packed parameter slab (VMEM): row 0 = u, row 1 = w
    u = uw_ref[0:1, :]            # (1, D)
    w = uw_ref[1:2, :]            # (1, D)

    z = z_ref[...]                # (block_b, D)

    # linear = z @ w + b  -- VPU multiply + lane reduce (K=50 too small for MXU)
    linear = jnp.sum(z * w, axis=-1, keepdims=True) + b        # (block_b, 1)
    activation = jnp.tanh(linear)                               # (block_b, 1)

    # z_new = z + u * activation
    z_out_ref[...] = z + u * activation                         # (block_b, D)

    # det_jac = |1 + (1 - act^2) * (w.u)|   (algebraic simplification of psi @ u)
    one_minus_a2 = 1.0 - activation * activation                # (block_b, 1)
    det_jac = jnp.abs(1.0 + one_minus_a2 * wu)                  # (block_b, 1)
    ld_out_ref[...] = jnp.log(det_jac + 1e-6)                   # (block_b, 1)


def _choose_block_b(B, max_block_b):
    """Pick a batch tile: full-dims single block for small B, otherwise a
    128-row-aligned block giving >= 2 grid steps (v7x megacore)."""
    max_block_b = max(128, (max_block_b // 128) * 128)
    if B <= 256:
        return B  # single block whose shape equals the full array dims
    half = _round_up(pl.cdiv(B, 2), 128)
    return min(max_block_b, half)


def flow_layer_forward(z, u, w, b, *, block_b=4096, min_pallas_batch=512):
    """Pallas FlowLayer forward.  Returns (z_new [B, D], log_det_jacobian [B])."""
    B, D = z.shape
    z = z.astype(jnp.float32)

    u1 = u.reshape(-1).astype(jnp.float32)
    w1 = w.reshape(-1).astype(jnp.float32)           # PyTorch w is (D, 1); squeeze it
    assert u1.shape == (D,) and w1.shape == (D,)
    assert b.size == 1, "FlowLayer bias must have exactly one element"

    if B < min_pallas_batch:
        # Tiny batches: a standalone kernel is pure dispatch + DMA-setup overhead;
        # let XLA fuse the few elementwise ops (or fuse this flow into the producer).
        return reference_forward(z, u1, w1.reshape(D, 1), b.astype(jnp.float32))

    uw = jnp.stack([u1, w1], axis=0)                  # (2, D) packed VMEM slab
    wu = jnp.sum(u1 * w1)                             # scalar u.w (parameter-only)
    scal = jnp.stack(
        [b.reshape(()).astype(jnp.float32), wu]
    )                                                 # (2,) SMEM scalars: [b, u.w]

    block_b = _choose_block_b(B, block_b)
    grid = (pl.cdiv(B, block_b),)                     # ragged last block handled by Pallas

    # VMEM budget (lane padding included): z + z_new blocks are block_b * ceil128(D)
    # f32 each, the (block_b, 1) log_det block lane-pads to 128; everything is
    # double-buffered by the pipeline.
    d_lanes = _round_up(D, 128)
    bytes_per_buf = block_b * d_lanes * 4 * 2 + block_b * 128 * 4 + 2 * d_lanes * 4
    vmem_limit = int(min(max(bytes_per_buf * 2 * 1.25, 8 * 1024 * 1024),
                         48 * 1024 * 1024))

    cost = pl.CostEstimate(
        flops=4 * B * D,                   # dot + z_new muls/adds
        transcendentals=2 * B,             # tanh + log per row
        bytes_accessed=8 * B * D + 8 * B,  # read z, write z_new (+ log_det)
    )

    z_new, log_det = pl.pallas_call(
        _flow_layer_kernel,
        out_shape=(
            jax.ShapeDtypeStruct((B, D), jnp.float32),
            jax.ShapeDtypeStruct((B, 1), jnp.float32),
        ),
        grid=grid,
        in_specs=[
            pl.BlockSpec(memory_space=pltpu.MemorySpace.SMEM),     # scalars [b, u.w]
            pl.BlockSpec((2, D), lambda i: (0, 0)),                # packed u/w slab
            pl.BlockSpec((block_b, D), lambda i: (i, 0)),          # z tile
        ],
        out_specs=(
            pl.BlockSpec((block_b, D), lambda i: (i, 0)),          # z_new tile
            pl.BlockSpec((block_b, 1), lambda i: (i, 0)),          # log_det tile
        ),
        compiler_params=pltpu.CompilerParams(
            dimension_semantics=("parallel",),
            vmem_limit_bytes=vmem_limit,
        ),
        cost_estimate=cost,
    )(scal, uw, z)

    return z_new, log_det[:, 0]


def reference_forward(z, u, w, b):
    """Plain-JAX reference matching the PyTorch FlowLayer semantics."""
    linear = z @ w + b                               # (B, 1)
    activation = jnp.tanh(linear)
    z_new = z + u[None, :] * activation
    psi = (1.0 - activation ** 2) * w.reshape(-1)    # (B, D)
    det_jacobian = jnp.abs(1.0 + psi @ u)            # (B,)
    log_det = jnp.log(det_jacobian + 1e-6)
    return z_new, log_det


if __name__ == "__main__":
    key = jax.random.PRNGKey(0)
    k_z1, k_z2, k_u, k_w = jax.random.split(key, 4)

    D = LATENT_DIM
    # Parameters mirroring the torch.randn / torch.zeros init shapes.
    u = jax.random.normal(k_u, (D,), dtype=jnp.float32)       # FlowLayer.u
    w = jax.random.normal(k_w, (D, 1), dtype=jnp.float32)     # FlowLayer.w
    b = jnp.zeros((1,), dtype=jnp.float32)                    # FlowLayer.b

    # Case 1: tiny batch -> single full-dims block, grid=(1,).  Force the Pallas path
    # (min_pallas_batch=0) so the kernel itself is exercised.
    B1 = 8
    z1 = jax.random.normal(k_z1, (B1, D), dtype=jnp.float32)
    zn1, ld1 = flow_layer_forward(z1, u, w, b, min_pallas_batch=0)
    jax.block_until_ready((zn1, ld1))
    zr1, lr1 = reference_forward(z1, u, w, b)
    assert zn1.shape == (B1, D) and ld1.shape == (B1,)
    assert jnp.allclose(zn1, zr1, atol=1e-5, rtol=1e-5), "z_new mismatch (B=8)"
    assert jnp.allclose(ld1, lr1, atol=1e-5, rtol=1e-5), "log_det mismatch (B=8)"

    # Case 2: batch not divisible by the block -> 2 grid steps, ragged last block
    # (no wrapper pad / slice; Pallas masks the tail stores).
    B2 = 300
    z2 = jax.random.normal(k_z2, (B2, D), dtype=jnp.float32)
    zn2, ld2 = flow_layer_forward(z2, u, w, b, min_pallas_batch=0)
    jax.block_until_ready((zn2, ld2))
    zr2, lr2 = reference_forward(z2, u, w, b)
    assert zn2.shape == (B2, D) and ld2.shape == (B2,)
    assert jnp.allclose(zn2, zr2, atol=1e-5, rtol=1e-5), "z_new mismatch (B=300)"
    assert jnp.allclose(ld2, lr2, atol=1e-5, rtol=1e-5), "log_det mismatch (B=300)"

    print("KERNEL_OK")
</pallas_src>

<mosaic_0001>
module attributes {stable_mosaic.version = 11 : i64} {
  func.func @_flow_layer_kernel(%arg0: i32, %arg1: memref<2xf32, #tpu.memory_space<smem>>, %arg2: memref<2x50xf32, #tpu.memory_space<vmem>>, %arg3: memref<8x50xf32, #tpu.memory_space<vmem>>, %arg4: memref<8x50xf32, #tpu.memory_space<vmem>>, %arg5: memref<8x1xf32, #tpu.memory_space<vmem>>) attributes {dimension_semantics = [#tpu.dimension_semantics<parallel>], iteration_bounds = array<i64: 1>, scalar_prefetch = 0 : i64, scratch_operands = 0 : i64, tpu.core_type = #tpu.core_type<tc>, window_params = [{transform_indices = @transform_0, window_bounds = array<i64: 2>}, {pipeline_mode = #tpu.pipeline_mode<synchronous>, transform_indices = @transform_1, window_bounds = array<i64: 2, 50>}, {transform_indices = @transform_2, window_bounds = array<i64: 8, 50>}, {transform_indices = @transform_3, window_bounds = array<i64: 8, 50>}, {transform_indices = @transform_4, window_bounds = array<i64: 8, 1>}]} {
    %c0 = arith.constant 0 : index
    %0 = memref.load %arg1[%c0] : memref<2xf32, #tpu.memory_space<smem>>
    %c1 = arith.constant 1 : index
    %1 = memref.load %arg1[%c1] : memref<2xf32, #tpu.memory_space<smem>>
    %c0_0 = arith.constant 0 : index
    %c0_1 = arith.constant 0 : index
    %2 = vector.load %arg2[%c0_0, %c0_1] : memref<2x50xf32, #tpu.memory_space<vmem>>, vector<1x50xf32>
    %c1_2 = arith.constant 1 : index
    %c0_3 = arith.constant 0 : index
    %3 = vector.load %arg2[%c1_2, %c0_3] : memref<2x50xf32, #tpu.memory_space<vmem>>, vector<1x50xf32>
    %c0_4 = arith.constant 0 : index
    %c0_5 = arith.constant 0 : index
    %4 = vector.load %arg3[%c0_4, %c0_5] : memref<8x50xf32, #tpu.memory_space<vmem>>, vector<8x50xf32>
    %5 = vector.broadcast %3 : vector<1x50xf32> to vector<8x50xf32>
    %6 = arith.mulf %4, %5 : vector<8x50xf32>
    %cst = arith.constant dense<0.000000e+00> : vector<8xf32>
    %7 = vector.multi_reduction <add>, %6, %cst [1] : vector<8x50xf32> to vector<8xf32>
    %8 = vector.shape_cast %7 : vector<8xf32> to vector<8x1xf32>
    %9 = vector.broadcast %0 : f32 to vector<8x1xf32>
    %10 = arith.addf %8, %9 : vector<8x1xf32>
    %11 = math.tanh %10 : vector<8x1xf32>
    %12 = vector.broadcast %2 : vector<1x50xf32> to vector<8x50xf32>
    %13 = vector.broadcast %11 : vector<8x1xf32> to vector<8x50xf32>
    %14 = arith.mulf %12, %13 : vector<8x50xf32>
    %15 = arith.addf %4, %14 : vector<8x50xf32>
    %c0_6 = arith.constant 0 : index
    %c0_7 = arith.constant 0 : index
    %16 = vector.load %arg4[%c0_6, %c0_7] : memref<8x50xf32, #tpu.memory_space<vmem>>, vector<8x50xf32>
    tpu.vector_store %arg4[%c0_6, %c0_7], %15 {strides = array<i32>} : memref<8x50xf32, #tpu.memory_space<vmem>>, vector<8x50xf32>,
    %17 = arith.mulf %11, %11 : vector<8x1xf32>
    %cst_8 = arith.constant 1.000000e+00 : f32
    %18 = vector.broadcast %cst_8 : f32 to vector<8x1xf32>
    %19 = arith.subf %18, %17 : vector<8x1xf32>
    %20 = vector.broadcast %1 : f32 to vector<8x1xf32>
    %21 = arith.mulf %19, %20 : vector<8x1xf32>
    %cst_9 = arith.constant 1.000000e+00 : f32
    %22 = vector.broadcast %cst_9 : f32 to vector<8x1xf32>
    %23 = arith.addf %22, %21 : vector<8x1xf32>
    %24 = math.absf %23 : vector<8x1xf32>
    %cst_10 = arith.constant 9.99999997E-7 : f32
    %25 = vector.broadcast %cst_10 : f32 to vector<8x1xf32>
    %26 = arith.addf %24, %25 : vector<8x1xf32>
    %27 = math.log %26 : vector<8x1xf32>
    %c0_11 = arith.constant 0 : index
    %c0_12 = arith.constant 0 : index
    %28 = vector.load %arg5[%c0_11, %c0_12] : memref<8x1xf32, #tpu.memory_space<vmem>>, vector<8x1xf32>
    tpu.vector_store %arg5[%c0_11, %c0_12], %27 {strides = array<i32>} : memref<8x1xf32, #tpu.memory_space<vmem>>, vector<8x1xf32>,
    return
  }
  func.func @transform_0(%arg0: i32) -> i32 {
    %c0_i32 = arith.constant 0 : i32
    %c0_i32_0 = arith.constant 0 : i32
    return %c0_i32 : i32
  }
  func.func @transform_1(%arg0: i32) -> (i32, i32) {
    %c0_i32 = arith.constant 0 : i32
    %c0_i32_0 = arith.constant 0 : i32
    %c0_i32_1 = arith.constant 0 : i32
    return %c0_i32, %c0_i32_0 : i32, i32
  }
  func.func @transform_2(%arg0: i32) -> (i32, i32) {
    %c0_i32 = arith.constant 0 : i32
    %c0_i32_0 = arith.constant 0 : i32
    return %arg0, %c0_i32 : i32, i32
  }
  func.func @transform_3(%arg0: i32) -> (i32, i32) {
    %c0_i32 = arith.constant 0 : i32
    %c0_i32_0 = arith.constant 0 : i32
    return %arg0, %c0_i32 : i32, i32
  }
  func.func @transform_4(%arg0: i32) -> (i32, i32) {
    %c0_i32 = arith.constant 0 : i32
    %c0_i32_0 = arith.constant 0 : i32
    return %arg0, %c0_i32 : i32, i32
  }
}

</mosaic_0001>

<bundles_post_ra>
// kernel: tpu_custom_call.1
= control target key start
LH: loop header
LB: loop body
LE: loop exit
PB: predicated region body
PF: predicated region fallthrough
CT: control target
= control target key end

     0   :  { %10 = vsyncpa [#allocation5], 0  ;;  %s259_s0 = inlined_call_operand.hbm [shape: f32[2], index: 0, kind: input, shape index: {}]   ;;  %s260_s1 = inlined_call_operand.hbm [shape: f32[2,50], index: 1, kind: input, shape index: {}]   ;;  %s261_s2 = inlined_call_operand.hbm [shape: f32[8,50], index: 2, kind: input, shape index: {}]   ;;  %s262_s3 = inlined_call_operand.hbm [shape: f32[8,50], index: 3, kind: output, shape index: {0}]   ;;  %s263_s4 = inlined_call_operand.vmem [shape: f32[8,1], index: 4, kind: output, shape index: {1}]  }
   0x1   :  { %11 = vsyncpa [#allocation3], 0 }
   0x2   :  { %12 = vsyncpa [#allocation8], 0 }
   0x3   :  { %13 = vsyncpa [#allocation4], 0  ;;  %s19_s17 = sshll.u32 %s259_s0, 4  ;;  %s28_s20 = sshll.u32 %s260_s1, 4  ;;  %s20_s17 = int_to_ptr.hbm [resolvable:$true] %s19_s17  ;;  %s29_s20 = int_to_ptr.hbm [resolvable:$true] %s28_s20 }
   0x4   :  { %s213_s21 = smov [#allocation2]   ;;  %s214_s22 = smov [#allocation6]  }
   0x5   :  { %22 = dma.hbm_to_smem %s20_s17, 16, %s213_s21, [#allocation5]  }
   0x6   :  { %s30_s23 = sshll.u32 %s214_s22, 4  ;;  %s39_s26 = sshll.u32 %s261_s2, 4  ;;  %s31_s23 = int_to_ptr.vmem [resolvable:$true] %s30_s23  ;;  %s40_s26 = int_to_ptr.hbm [resolvable:$true] %s39_s26 }
   0x7   :  { %33 = dma.hbm_to_vmem [thread:$0]  %s29_s20, 32, %s31_s23, [#allocation3]  }
   0x8   :  { %s215_s27 = smov [#allocation7]  }
   0x9   :  { %s41_s28 = sshll.u32 %s215_s27, 4  ;;  %s42_s28 = int_to_ptr.vmem [resolvable:$true] %s41_s28 }
   0xa   :  { %44 = dma.hbm_to_vmem [thread:$0]  %s40_s26, 128, %s42_s28, [#allocation8]  }
   0xb   :  { %205 = dma.done.wait [#allocation5], 16  }
   0xc   :  { %206 = vsyncadd [#allocation5], 4294967280 }
   0xd   :  { %207 = dma.done.wait [#allocation3], 32  }
   0xe   :  { %208 = vsyncadd [#allocation3], 4294967264 }
   0xf   :  { %209 = dma.done.wait [#allocation8], 128  }
  0x10   :  { %210 = vsyncadd [#allocation8], 4294967168 }
  0x11   :  { %57 = sfence }
  0x12   :  { %v62_v0 = vld [vmem:[#allocation7] sm:$0xff]  ;;  %v115_v1 = vld [vmem:[#allocation6 + $0x1] ss:$0 sm:$0xff]  ;;  %vm65_vm0 = vcmask 408576   ;;  %s58_s0 = sld [smem:[#allocation2]]  ;;  %s216_s2 = smov [#allocation9]  }
  0x13   :  { %v64_v2 = vmul.f32 %v115_v1, %v62_v0  ;;  %s110_s1 = sld [smem:[#allocation2 + $0x1]]  ;;  %v116_v7 = vld [vmem:[#allocation6] ss:$0 sm:$0xff]  ;;  %s92_s29 = sshll.u32 %s216_s2, 4  ;;  %vm85_vm1 = vcmask 7168   ;;  %s93_s29 = int_to_ptr.vmem [resolvable:$true] %s92_s29 }
  0x14   :  { %s94_s6 = sshll.u32 %s262_s3, 4  ;;  %s95_s6 = int_to_ptr.hbm [resolvable:$true] %s94_s6 }
  0x15   :  { %v66_v3 = vsel %vm65_vm0, %v64_v2, 0.0 }
  0x16   :  { %67 = vadd.xlane.f32.xlu0 %v66_v3 }
  0x18   :  { %v69_v4 = vstv %s58_s0 }
  0x19   :  { %v78_v11 = vstv %s110_s1 }
  0x89   :  { %v68_v5 = vpop.xlane.xlu0 %67 }
  0x8a   :  { %v70_v6 = vadd.f32 %v69_v4, %v68_v5 }
  0x8c   :  { %117 = vtanh.f32 %v70_v6 }
  0x92   :  { %v118_v8 = vpop.eup %117 }
  0x93   :  { %v76_v9 = vmul.f32 %v118_v8, %v118_v8  ;;  %v73_v10 = vmul.f32 %v118_v8, %v116_v7 }
  0x95   :  { %v77_v12 = vsub.f32 1.0, %v76_v9  ;;  %v74_v13 = vadd.f32 %v73_v10, %v62_v0 }
  0x97   :  { %v79_v14 = vmul.f32 %v78_v11, %v77_v12  ;;  %75 = vst.msk [vmem:[#allocation9] sm:$0xff] %vm65_vm0, %v74_v13 }
  0x98   :  { %97 = dma.vmem_to_hbm [thread:$0]  %s93_s29, 128, %s95_s6, [#allocation4]  }
  0x99   :  { %v80_v15 = vadd.f32 1.0, %v79_v14 }
  0x9b   :  { %v81_v16 = vand.u32 2147483647, %v80_v15 }
  0x9d   :  { %v82_v17 = vadd.f32 1e-06, %v81_v16 }
  0x9f   :  { %119 = vlog2.f32 %v82_v17 }
  0xa5   :  { %v120_v18 = vpop.eup %119 }
  0xa6   :  { %v84_v19 = vmul.f32 0.6931472, %v120_v18 }
  0xa8   :  { %86 = vst.msk [vmem:[%s263_s4] sm:$0xff] %vm85_vm1, %v84_v19 }
  0xa9   :  { %211 = dma.done.wait [#allocation4], 128  }
  0xaa   :  { %212 = vsyncadd [#allocation4], 4294967168 }
  0xab   :  { %106 = vsyncpa [#allocation3], 1 }
  0xac   :  { %107 = vsyncpa [#allocation8], 1 }
  0xad   :  { %108 = vsyncpa [#allocation4], 1 }
  0xae   :  { %109 = vsyncpa [#allocation5], 1 }

</bundles_post_ra>
